<compile_context>
chip_gen: v7x
topology: tpu7x:2x2x1
jax: 0.10.0
libtpu: 0.0.40
codegen_flags: <defaults>
</compile_context>

<pallas_src>
import functools

import numpy as np
import jax
import jax.numpy as jnp
from jax.experimental import pallas as pl
from jax.experimental.pallas import tpu as pltpu


def _block_kernel(x_ref, w1_ref, w2_ref, b_ref, m_ref, o_ref, patch_ref, *, width):
    # x_ref:  (1, C, Nb*HW) f32   -- channels on sublanes, Nb images' spatial on lanes
    # w1_ref: (Cout, 9*Cin)  mxu dtype, BN scale pre-folded
    # w2_ref: (Cout, 9*Cout) mxu dtype, BN scale pre-folded
    # b_ref:  (Cout, 1) f32  folded batch_norm2 bias
    # m_ref:  (9*Cin, Nb*HW) tap dtype -- per-tap zero-pad masks, pre-broadcast over C
    # o_ref:  (1, Cout, Nb*HW) f32
    # patch_ref: (9*Cin, Nb*HW) mxu dtype VMEM scratch (im2col patch)
    C = x_ref.shape[1]
    NHW = x_ref.shape[2]
    W = width
    tap_dtype = m_ref.dtype
    mxu_dtype = patch_ref.dtype

    x = x_ref[0]                       # (C, NHW) f32, kept for the residual add
    w1 = w1_ref[...]
    w2 = w2_ref[...]
    bias = b_ref[...]                  # (Cout, 1) f32

    def build_patch(inp):
        # inp: (C, NHW) in tap_dtype.  Realize the 9 taps with lane rolls (XLU)
        # + boundary-mask multiplies (VPU); store each tap straight into the
        # scratch patch (no concatenate, bounded live ranges).
        t = 0
        for dy in (-1, 0, 1):
            for dx in (-1, 0, 1):
                off = dy * W + dx
                if off == 0:
                    tap = inp                                  # center tap, mask == 1
                else:
                    rolled = pltpu.roll(inp, shift=(-off) % NHW, axis=1)
                    tap = rolled * m_ref[t * C:(t + 1) * C, :]
                patch_ref[t * C:(t + 1) * C, :] = tap.astype(mxu_dtype)
                t += 1

    # ---- conv1 -> batch_norm2 (scale folded into w1) -> ReLU ----
    build_patch(x.astype(tap_dtype))
    acc1 = jnp.dot(w1, patch_ref[...], preferred_element_type=jnp.float32)  # (Cout, NHW)
    y = jnp.maximum(acc1 + bias, 0.0)

    # ---- conv2 -> batch_norm2 (scale folded into w2) ----
    build_patch(y.astype(tap_dtype))
    acc2 = jnp.dot(w2, patch_ref[...], preferred_element_type=jnp.float32)  # (Cout, NHW)

    # ---- residual add (identity path, Cin == Cout) + ReLU ----
    o_ref[0] = jnp.maximum(acc2 + bias + x, 0.0)


def _device_kind():
    try:
        return jax.devices()[0].device_kind.lower()
    except Exception:
        return ""


def block_forward(x_nchw, w1, w2, scale, bias, *,
                  images_per_step=None, use_bf16_mxu=True, tap_build_bf16=None):
    """x_nchw: (N, C, H, W) f32; w1/w2: HWIO (3,3,C,C); scale/bias: folded BN (C,).
    Returns (N, C, H, W) f32."""
    N, C, H, W = x_nchw.shape
    kh, kw, cin, cout = w1.shape
    assert (kh, kw) == (3, 3) and cin == C and cout == C, \
        "residual path requires Cin == Cout, 3x3 kernels"
    HW = H * W

    kind = _device_kind()
    if images_per_step is None:
        # v7x has 2 TensorCores per chip: keep one grid step per core.
        # v5e/v6e (1 TC): process the whole batch in one step.
        num_cores = 2 if "v7" in kind else 1
        images_per_step = max(1, -(-N // num_cores))
    Nb = max(1, min(images_per_step, N))
    while N % Nb:
        Nb -= 1
    G = N // Nb
    NHW = Nb * HW

    if tap_build_bf16 is None:
        # bf16 VPU/XLU exist on v6e/v7x; v5e keeps the mask multiply in f32.
        tap_build_bf16 = use_bf16_mxu and (("v6" in kind) or ("v7" in kind))

    mxu_dtype = jnp.bfloat16 if use_bf16_mxu else jnp.float32
    tap_dtype = jnp.bfloat16 if (tap_build_bf16 and use_bf16_mxu) else jnp.float32

    # (N, C, H, W) -> (G, C, Nb*HW): fold Nb images into the lane axis.
    x_g = (x_nchw.astype(jnp.float32)
           .reshape(G, Nb, C, HW)
           .transpose(0, 2, 1, 3)
           .reshape(G, C, NHW))

    # Fold BN scale into the conv weights in f32, then cast; im2col form
    # (Cout, 9*Cin) with row = tap*Cin + ci (matches the patch layout).
    scale_f = scale.astype(jnp.float32)
    w1_t = jnp.transpose((w1.astype(jnp.float32) * scale_f[None, None, None, :])
                         .reshape(9 * C, cout)).astype(mxu_dtype)
    w2_t = jnp.transpose((w2.astype(jnp.float32) * scale_f[None, None, None, :])
                         .reshape(9 * cout, cout)).astype(mxu_dtype)

    # Per-tap zero-padding masks on the flattened spatial axis, tiled per image
    # and pre-broadcast over the C input channels (compile-time host constants).
    base = np.zeros((9, HW), np.float32)
    yy, xx = np.meshgrid(np.arange(H), np.arange(W), indexing="ij")
    t = 0
    for dy in (-1, 0, 1):
        for dx in (-1, 0, 1):
            ok = (yy + dy >= 0) & (yy + dy < H) & (xx + dx >= 0) & (xx + dx < W)
            base[t] = ok.reshape(-1).astype(np.float32)
            t += 1
    masks = np.repeat(np.tile(base, (1, Nb)), C, axis=0)        # (9*C, Nb*HW)
    masks = jnp.asarray(masks, dtype=tap_dtype)

    kernel = functools.partial(_block_kernel, width=W)

    out = pl.pallas_call(
        kernel,
        out_shape=jax.ShapeDtypeStruct((G, cout, NHW), jnp.float32),
        grid_spec=pltpu.PrefetchScalarGridSpec(
            num_scalar_prefetch=0,
            grid=(G,),   # one slab of Nb images per step; one step per TC on v7x
            in_specs=[
                pl.BlockSpec((1, C, NHW), lambda g: (g, 0, 0)),
                pl.BlockSpec((cout, 9 * C), lambda g: (0, 0)),
                pl.BlockSpec((cout, 9 * cout), lambda g: (0, 0)),
                pl.BlockSpec((cout, 1), lambda g: (0, 0)),
                pl.BlockSpec((9 * C, NHW), lambda g: (0, 0)),
            ],
            out_specs=pl.BlockSpec((1, cout, NHW), lambda g: (g, 0, 0)),
            scratch_shapes=[pltpu.VMEM((9 * C, NHW), mxu_dtype)],
        ),
        compiler_params=pltpu.CompilerParams(
            dimension_semantics=("parallel",)),
    )(x_g, w1_t, w2_t,
      bias.reshape(cout, 1).astype(jnp.float32),
      masks)

    # (G, C, Nb*HW) -> (N, C, H, W)
    return (out.reshape(G, cout, Nb, HW)
            .transpose(0, 2, 1, 3)
            .reshape(N, cout, H, W))


def _reference(x, w1, w2, scale, bias, *, use_bf16=True):
    """Pure-JAX reference of the (quirky-but-faithful) forward pass, with the
    same quantization points as the kernel (scale folded into weights in f32,
    then cast; conv inputs cast; f32 accumulation / BN / residual)."""
    dn = jax.lax.conv_dimension_numbers(x.shape, w1.shape,
                                        ('NCHW', 'HWIO', 'NCHW'))
    cdt = jnp.bfloat16 if use_bf16 else jnp.float32
    s = scale.astype(jnp.float32)
    b = bias.reshape(1, -1, 1, 1).astype(jnp.float32)
    w1f = (w1.astype(jnp.float32) * s[None, None, None, :]).astype(cdt)
    w2f = (w2.astype(jnp.float32) * s[None, None, None, :]).astype(cdt)
    y = jax.lax.conv_general_dilated(x.astype(cdt), w1f, (1, 1), 'SAME',
                                     dimension_numbers=dn,
                                     preferred_element_type=jnp.float32)
    y = jnp.maximum(y + b, 0.0)
    z = jax.lax.conv_general_dilated(y.astype(cdt), w2f, (1, 1), 'SAME',
                                     dimension_numbers=dn,
                                     preferred_element_type=jnp.float32)
    z = z + b
    return jnp.maximum(z + x, 0.0)


if __name__ == "__main__":
    key = jax.random.PRNGKey(0)
    k1, k2, k3, k4, k5, k6, k7 = jax.random.split(key, 7)

    # Block(in_channels=8, out_channels=8, i_downsample=None, stride=1)
    N, C, H, W = 2, 8, 16, 16
    Cout = C

    x = jax.random.normal(k1, (N, C, H, W), jnp.float32)             # NCHW
    w1 = jax.random.normal(k2, (3, 3, C, Cout), jnp.float32) * 0.1   # HWIO
    w2 = jax.random.normal(k3, (3, 3, Cout, Cout), jnp.float32) * 0.1

    # batch_norm2 parameters (the only BN the forward actually applies),
    # folded into per-channel scale / bias (inference mode).
    gamma = jax.random.uniform(k4, (Cout,), jnp.float32, 0.5, 1.5)
    beta = jax.random.normal(k5, (Cout,), jnp.float32) * 0.1
    run_mean = jax.random.normal(k6, (Cout,), jnp.float32) * 0.1
    run_var = jnp.abs(jax.random.normal(k7, (Cout,), jnp.float32)) + 0.5
    eps = 1e-5
    scale = gamma / jnp.sqrt(run_var + eps)
    bias = beta - run_mean * scale

    out = block_forward(x, w1, w2, scale, bias, use_bf16_mxu=True)
    jax.block_until_ready(out)

    ref = _reference(x, w1, w2, scale, bias, use_bf16=True)
    assert out.shape == (N, Cout, H, W)
    max_err = float(jnp.max(jnp.abs(out - ref)))
    assert jnp.allclose(out, ref, atol=2e-3, rtol=2e-3), max_err

    print("KERNEL_OK")
</pallas_src>

<mosaic_0001>
module attributes {stable_mosaic.version = 11 : i64} {
  func.func @_block_kernel(%arg0: i32, %arg1: memref<1x8x512xf32, #tpu.memory_space<vmem>>, %arg2: memref<8x72xbf16, #tpu.memory_space<vmem>>, %arg3: memref<8x72xbf16, #tpu.memory_space<vmem>>, %arg4: memref<8x1xf32, #tpu.memory_space<vmem>>, %arg5: memref<72x512xf32, #tpu.memory_space<vmem>>, %arg6: memref<1x8x512xf32, #tpu.memory_space<vmem>>, %arg7: memref<72x512xbf16, #tpu.memory_space<vmem>>) attributes {dimension_semantics = [#tpu.dimension_semantics<parallel>], iteration_bounds = array<i64: 1>, scalar_prefetch = 0 : i64, scratch_operands = 1 : i64, tpu.core_type = #tpu.core_type<tc>, window_params = [{transform_indices = @transform_0, window_bounds = array<i64: 1, 8, 512>}, {pipeline_mode = #tpu.pipeline_mode<synchronous>, transform_indices = @transform_1, window_bounds = array<i64: 8, 72>}, {pipeline_mode = #tpu.pipeline_mode<synchronous>, transform_indices = @transform_2, window_bounds = array<i64: 8, 72>}, {pipeline_mode = #tpu.pipeline_mode<synchronous>, transform_indices = @transform_3, window_bounds = array<i64: 8, 1>}, {pipeline_mode = #tpu.pipeline_mode<synchronous>, transform_indices = @transform_4, window_bounds = array<i64: 72, 512>}, {transform_indices = @transform_5, window_bounds = array<i64: 1, 8, 512>}]} {
    %c0 = arith.constant 0 : index
    %c0_0 = arith.constant 0 : index
    %c0_1 = arith.constant 0 : index
    %0 = vector.load %arg1[%c0, %c0_0, %c0_1] : memref<1x8x512xf32, #tpu.memory_space<vmem>>, vector<1x8x512xf32>
    %1 = vector.shape_cast %0 : vector<1x8x512xf32> to vector<8x512xf32>
    %c0_2 = arith.constant 0 : index
    %c0_3 = arith.constant 0 : index
    %2 = vector.load %arg2[%c0_2, %c0_3] : memref<8x72xbf16, #tpu.memory_space<vmem>>, vector<8x72xbf16>
    %c0_4 = arith.constant 0 : index
    %c0_5 = arith.constant 0 : index
    %3 = vector.load %arg3[%c0_4, %c0_5] : memref<8x72xbf16, #tpu.memory_space<vmem>>, vector<8x72xbf16>
    %c0_6 = arith.constant 0 : index
    %c0_7 = arith.constant 0 : index
    %4 = vector.load %arg4[%c0_6, %c0_7] : memref<8x1xf32, #tpu.memory_space<vmem>>, vector<8x1xf32>
    %c17_i32 = arith.constant 17 : i32
    %5 = tpu.dynamic_rotate %1 by %c17_i32 dim 1 : vector<8x512xf32>, i32 -> vector<8x512xf32>
    %c0_8 = arith.constant 0 : index
    %c0_9 = arith.constant 0 : index
    %6 = vector.load %arg5[%c0_8, %c0_9] : memref<72x512xf32, #tpu.memory_space<vmem>>, vector<8x512xf32>
    %7 = arith.mulf %5, %6 : vector<8x512xf32>
    %8 = arith.truncf %7 : vector<8x512xf32> to vector<8x512xbf16>
    %c0_10 = arith.constant 0 : index
    %c0_11 = arith.constant 0 : index
    %9 = vector.load %arg7[%c0_10, %c0_11] : memref<72x512xbf16, #tpu.memory_space<vmem>>, vector<8x512xbf16>
    tpu.vector_store %arg7[%c0_10, %c0_11], %8 {strides = array<i32>} : memref<72x512xbf16, #tpu.memory_space<vmem>>, vector<8x512xbf16>,
    %c16_i32 = arith.constant 16 : i32
    %10 = tpu.dynamic_rotate %1 by %c16_i32 dim 1 : vector<8x512xf32>, i32 -> vector<8x512xf32>
    %c8 = arith.constant 8 : index
    %c0_12 = arith.constant 0 : index
    %11 = vector.load %arg5[%c8, %c0_12] : memref<72x512xf32, #tpu.memory_space<vmem>>, vector<8x512xf32>
    %12 = arith.mulf %10, %11 : vector<8x512xf32>
    %13 = arith.truncf %12 : vector<8x512xf32> to vector<8x512xbf16>
    %c8_13 = arith.constant 8 : index
    %c0_14 = arith.constant 0 : index
    %14 = vector.load %arg7[%c8_13, %c0_14] : memref<72x512xbf16, #tpu.memory_space<vmem>>, vector<8x512xbf16>
    tpu.vector_store %arg7[%c8_13, %c0_14], %13 {strides = array<i32>} : memref<72x512xbf16, #tpu.memory_space<vmem>>, vector<8x512xbf16>,
    %c15_i32 = arith.constant 15 : i32
    %15 = tpu.dynamic_rotate %1 by %c15_i32 dim 1 : vector<8x512xf32>, i32 -> vector<8x512xf32>
    %c16 = arith.constant 16 : index
    %c0_15 = arith.constant 0 : index
    %16 = vector.load %arg5[%c16, %c0_15] : memref<72x512xf32, #tpu.memory_space<vmem>>, vector<8x512xf32>
    %17 = arith.mulf %15, %16 : vector<8x512xf32>
    %18 = arith.truncf %17 : vector<8x512xf32> to vector<8x512xbf16>
    %c16_16 = arith.constant 16 : index
    %c0_17 = arith.constant 0 : index
    %19 = vector.load %arg7[%c16_16, %c0_17] : memref<72x512xbf16, #tpu.memory_space<vmem>>, vector<8x512xbf16>
    tpu.vector_store %arg7[%c16_16, %c0_17], %18 {strides = array<i32>} : memref<72x512xbf16, #tpu.memory_space<vmem>>, vector<8x512xbf16>,
    %c1_i32 = arith.constant 1 : i32
    %20 = tpu.dynamic_rotate %1 by %c1_i32 dim 1 : vector<8x512xf32>, i32 -> vector<8x512xf32>
    %c24 = arith.constant 24 : index
    %c0_18 = arith.constant 0 : index
    %21 = vector.load %arg5[%c24, %c0_18] : memref<72x512xf32, #tpu.memory_space<vmem>>, vector<8x512xf32>
    %22 = arith.mulf %20, %21 : vector<8x512xf32>
    %23 = arith.truncf %22 : vector<8x512xf32> to vector<8x512xbf16>
    %c24_19 = arith.constant 24 : index
    %c0_20 = arith.constant 0 : index
    %24 = vector.load %arg7[%c24_19, %c0_20] : memref<72x512xbf16, #tpu.memory_space<vmem>>, vector<8x512xbf16>
    tpu.vector_store %arg7[%c24_19, %c0_20], %23 {strides = array<i32>} : memref<72x512xbf16, #tpu.memory_space<vmem>>, vector<8x512xbf16>,
    %25 = arith.truncf %1 : vector<8x512xf32> to vector<8x512xbf16>
    %c32 = arith.constant 32 : index
    %c0_21 = arith.constant 0 : index
    %26 = vector.load %arg7[%c32, %c0_21] : memref<72x512xbf16, #tpu.memory_space<vmem>>, vector<8x512xbf16>
    tpu.vector_store %arg7[%c32, %c0_21], %25 {strides = array<i32>} : memref<72x512xbf16, #tpu.memory_space<vmem>>, vector<8x512xbf16>,
    %c511_i32 = arith.constant 511 : i32
    %27 = tpu.dynamic_rotate %1 by %c511_i32 dim 1 : vector<8x512xf32>, i32 -> vector<8x512xf32>
    %c40 = arith.constant 40 : index
    %c0_22 = arith.constant 0 : index
    %28 = vector.load %arg5[%c40, %c0_22] : memref<72x512xf32, #tpu.memory_space<vmem>>, vector<8x512xf32>
    %29 = arith.mulf %27, %28 : vector<8x512xf32>
    %30 = arith.truncf %29 : vector<8x512xf32> to vector<8x512xbf16>
    %c40_23 = arith.constant 40 : index
    %c0_24 = arith.constant 0 : index
    %31 = vector.load %arg7[%c40_23, %c0_24] : memref<72x512xbf16, #tpu.memory_space<vmem>>, vector<8x512xbf16>
    tpu.vector_store %arg7[%c40_23, %c0_24], %30 {strides = array<i32>} : memref<72x512xbf16, #tpu.memory_space<vmem>>, vector<8x512xbf16>,
    %c497_i32 = arith.constant 497 : i32
    %32 = tpu.dynamic_rotate %1 by %c497_i32 dim 1 : vector<8x512xf32>, i32 -> vector<8x512xf32>
    %c48 = arith.constant 48 : index
    %c0_25 = arith.constant 0 : index
    %33 = vector.load %arg5[%c48, %c0_25] : memref<72x512xf32, #tpu.memory_space<vmem>>, vector<8x512xf32>
    %34 = arith.mulf %32, %33 : vector<8x512xf32>
    %35 = arith.truncf %34 : vector<8x512xf32> to vector<8x512xbf16>
    %c48_26 = arith.constant 48 : index
    %c0_27 = arith.constant 0 : index
    %36 = vector.load %arg7[%c48_26, %c0_27] : memref<72x512xbf16, #tpu.memory_space<vmem>>, vector<8x512xbf16>
    tpu.vector_store %arg7[%c48_26, %c0_27], %35 {strides = array<i32>} : memref<72x512xbf16, #tpu.memory_space<vmem>>, vector<8x512xbf16>,
    %c496_i32 = arith.constant 496 : i32
    %37 = tpu.dynamic_rotate %1 by %c496_i32 dim 1 : vector<8x512xf32>, i32 -> vector<8x512xf32>
    %c56 = arith.constant 56 : index
    %c0_28 = arith.constant 0 : index
    %38 = vector.load %arg5[%c56, %c0_28] : memref<72x512xf32, #tpu.memory_space<vmem>>, vector<8x512xf32>
    %39 = arith.mulf %37, %38 : vector<8x512xf32>
    %40 = arith.truncf %39 : vector<8x512xf32> to vector<8x512xbf16>
    %c56_29 = arith.constant 56 : index
    %c0_30 = arith.constant 0 : index
    %41 = vector.load %arg7[%c56_29, %c0_30] : memref<72x512xbf16, #tpu.memory_space<vmem>>, vector<8x512xbf16>
    tpu.vector_store %arg7[%c56_29, %c0_30], %40 {strides = array<i32>} : memref<72x512xbf16, #tpu.memory_space<vmem>>, vector<8x512xbf16>,
    %c495_i32 = arith.constant 495 : i32
    %42 = tpu.dynamic_rotate %1 by %c495_i32 dim 1 : vector<8x512xf32>, i32 -> vector<8x512xf32>
    %c64 = arith.constant 64 : index
    %c0_31 = arith.constant 0 : index
    %43 = vector.load %arg5[%c64, %c0_31] : memref<72x512xf32, #tpu.memory_space<vmem>>, vector<8x512xf32>
    %44 = arith.mulf %42, %43 : vector<8x512xf32>
    %45 = arith.truncf %44 : vector<8x512xf32> to vector<8x512xbf16>
    %c64_32 = arith.constant 64 : index
    %c0_33 = arith.constant 0 : index
    %46 = vector.load %arg7[%c64_32, %c0_33] : memref<72x512xbf16, #tpu.memory_space<vmem>>, vector<8x512xbf16>
    tpu.vector_store %arg7[%c64_32, %c0_33], %45 {strides = array<i32>} : memref<72x512xbf16, #tpu.memory_space<vmem>>, vector<8x512xbf16>,
    %c0_34 = arith.constant 0 : index
    %c0_35 = arith.constant 0 : index
    %47 = vector.load %arg7[%c0_34, %c0_35] : memref<72x512xbf16, #tpu.memory_space<vmem>>, vector<72x512xbf16>
    %cst = arith.constant dense<0.000000e+00> : vector<8x512xf32>
    %48 = tpu.matmul %2, %47, %cst {dimension_numbers = #tpu.dot_dimension_numbers<[1], [0], [0], [1], [0, 0, 1, 1], [], []>} : vector<8x72xbf16>, vector<72x512xbf16>, vector<8x512xf32> -> vector<8x512xf32>
    %49 = vector.broadcast %4 : vector<8x1xf32> to vector<8x512xf32>
    %50 = arith.addf %48, %49 : vector<8x512xf32>
    %cst_36 = arith.constant 0.000000e+00 : f32
    %51 = vector.broadcast %cst_36 : f32 to vector<8x512xf32>
    %52 = arith.maximumf %50, %51 : vector<8x512xf32>
    %c17_i32_37 = arith.constant 17 : i32
    %53 = tpu.dynamic_rotate %52 by %c17_i32_37 dim 1 : vector<8x512xf32>, i32 -> vector<8x512xf32>
    %c0_38 = arith.constant 0 : index
    %c0_39 = arith.constant 0 : index
    %54 = vector.load %arg5[%c0_38, %c0_39] : memref<72x512xf32, #tpu.memory_space<vmem>>, vector<8x512xf32>
    %55 = arith.mulf %53, %54 : vector<8x512xf32>
    %56 = arith.truncf %55 : vector<8x512xf32> to vector<8x512xbf16>
    %c0_40 = arith.constant 0 : index
    %c0_41 = arith.constant 0 : index
    %57 = vector.load %arg7[%c0_40, %c0_41] : memref<72x512xbf16, #tpu.memory_space<vmem>>, vector<8x512xbf16>
    tpu.vector_store %arg7[%c0_40, %c0_41], %56 {strides = array<i32>} : memref<72x512xbf16, #tpu.memory_space<vmem>>, vector<8x512xbf16>,
    %c16_i32_42 = arith.constant 16 : i32
    %58 = tpu.dynamic_rotate %52 by %c16_i32_42 dim 1 : vector<8x512xf32>, i32 -> vector<8x512xf32>
    %c8_43 = arith.constant 8 : index
    %c0_44 = arith.constant 0 : index
    %59 = vector.load %arg5[%c8_43, %c0_44] : memref<72x512xf32, #tpu.memory_space<vmem>>, vector<8x512xf32>
    %60 = arith.mulf %58, %59 : vector<8x512xf32>
    %61 = arith.truncf %60 : vector<8x512xf32> to vector<8x512xbf16>
    %c8_45 = arith.constant 8 : index
    %c0_46 = arith.constant 0 : index
    %62 = vector.load %arg7[%c8_45, %c0_46] : memref<72x512xbf16, #tpu.memory_space<vmem>>, vector<8x512xbf16>
    tpu.vector_store %arg7[%c8_45, %c0_46], %61 {strides = array<i32>} : memref<72x512xbf16, #tpu.memory_space<vmem>>, vector<8x512xbf16>,
    %c15_i32_47 = arith.constant 15 : i32
    %63 = tpu.dynamic_rotate %52 by %c15_i32_47 dim 1 : vector<8x512xf32>, i32 -> vector<8x512xf32>
    %c16_48 = arith.constant 16 : index
    %c0_49 = arith.constant 0 : index
    %64 = vector.load %arg5[%c16_48, %c0_49] : memref<72x512xf32, #tpu.memory_space<vmem>>, vector<8x512xf32>
    %65 = arith.mulf %63, %64 : vector<8x512xf32>
    %66 = arith.truncf %65 : vector<8x512xf32> to vector<8x512xbf16>
    %c16_50 = arith.constant 16 : index
    %c0_51 = arith.constant 0 : index
    %67 = vector.load %arg7[%c16_50, %c0_51] : memref<72x512xbf16, #tpu.memory_space<vmem>>, vector<8x512xbf16>
    tpu.vector_store %arg7[%c16_50, %c0_51], %66 {strides = array<i32>} : memref<72x512xbf16, #tpu.memory_space<vmem>>, vector<8x512xbf16>,
    %c1_i32_52 = arith.constant 1 : i32
    %68 = tpu.dynamic_rotate %52 by %c1_i32_52 dim 1 : vector<8x512xf32>, i32 -> vector<8x512xf32>
    %c24_53 = arith.constant 24 : index
    %c0_54 = arith.constant 0 : index
    %69 = vector.load %arg5[%c24_53, %c0_54] : memref<72x512xf32, #tpu.memory_space<vmem>>, vector<8x512xf32>
    %70 = arith.mulf %68, %69 : vector<8x512xf32>
    %71 = arith.truncf %70 : vector<8x512xf32> to vector<8x512xbf16>
    %c24_55 = arith.constant 24 : index
    %c0_56 = arith.constant 0 : index
    %72 = vector.load %arg7[%c24_55, %c0_56] : memref<72x512xbf16, #tpu.memory_space<vmem>>, vector<8x512xbf16>
    tpu.vector_store %arg7[%c24_55, %c0_56], %71 {strides = array<i32>} : memref<72x512xbf16, #tpu.memory_space<vmem>>, vector<8x512xbf16>,
    %73 = arith.truncf %52 : vector<8x512xf32> to vector<8x512xbf16>
    %c32_57 = arith.constant 32 : index
    %c0_58 = arith.constant 0 : index
    %74 = vector.load %arg7[%c32_57, %c0_58] : memref<72x512xbf16, #tpu.memory_space<vmem>>, vector<8x512xbf16>
    tpu.vector_store %arg7[%c32_57, %c0_58], %73 {strides = array<i32>} : memref<72x512xbf16, #tpu.memory_space<vmem>>, vector<8x512xbf16>,
    %c511_i32_59 = arith.constant 511 : i32
    %75 = tpu.dynamic_rotate %52 by %c511_i32_59 dim 1 : vector<8x512xf32>, i32 -> vector<8x512xf32>
    %c40_60 = arith.constant 40 : index
    %c0_61 = arith.constant 0 : index
    %76 = vector.load %arg5[%c40_60, %c0_61] : memref<72x512xf32, #tpu.memory_space<vmem>>, vector<8x512xf32>
    %77 = arith.mulf %75, %76 : vector<8x512xf32>
    %78 = arith.truncf %77 : vector<8x512xf32> to vector<8x512xbf16>
    %c40_62 = arith.constant 40 : index
    %c0_63 = arith.constant 0 : index
    %79 = vector.load %arg7[%c40_62, %c0_63] : memref<72x512xbf16, #tpu.memory_space<vmem>>, vector<8x512xbf16>
    tpu.vector_store %arg7[%c40_62, %c0_63], %78 {strides = array<i32>} : memref<72x512xbf16, #tpu.memory_space<vmem>>, vector<8x512xbf16>,
    %c497_i32_64 = arith.constant 497 : i32
    %80 = tpu.dynamic_rotate %52 by %c497_i32_64 dim 1 : vector<8x512xf32>, i32 -> vector<8x512xf32>
    %c48_65 = arith.constant 48 : index
    %c0_66 = arith.constant 0 : index
    %81 = vector.load %arg5[%c48_65, %c0_66] : memref<72x512xf32, #tpu.memory_space<vmem>>, vector<8x512xf32>
    %82 = arith.mulf %80, %81 : vector<8x512xf32>
    %83 = arith.truncf %82 : vector<8x512xf32> to vector<8x512xbf16>
    %c48_67 = arith.constant 48 : index
    %c0_68 = arith.constant 0 : index
    %84 = vector.load %arg7[%c48_67, %c0_68] : memref<72x512xbf16, #tpu.memory_space<vmem>>, vector<8x512xbf16>
    tpu.vector_store %arg7[%c48_67, %c0_68], %83 {strides = array<i32>} : memref<72x512xbf16, #tpu.memory_space<vmem>>, vector<8x512xbf16>,
    %c496_i32_69 = arith.constant 496 : i32
    %85 = tpu.dynamic_rotate %52 by %c496_i32_69 dim 1 : vector<8x512xf32>, i32 -> vector<8x512xf32>
    %c56_70 = arith.constant 56 : index
    %c0_71 = arith.constant 0 : index
    %86 = vector.load %arg5[%c56_70, %c0_71] : memref<72x512xf32, #tpu.memory_space<vmem>>, vector<8x512xf32>
    %87 = arith.mulf %85, %86 : vector<8x512xf32>
    %88 = arith.truncf %87 : vector<8x512xf32> to vector<8x512xbf16>
    %c56_72 = arith.constant 56 : index
    %c0_73 = arith.constant 0 : index
    %89 = vector.load %arg7[%c56_72, %c0_73] : memref<72x512xbf16, #tpu.memory_space<vmem>>, vector<8x512xbf16>
    tpu.vector_store %arg7[%c56_72, %c0_73], %88 {strides = array<i32>} : memref<72x512xbf16, #tpu.memory_space<vmem>>, vector<8x512xbf16>,
    %c495_i32_74 = arith.constant 495 : i32
    %90 = tpu.dynamic_rotate %52 by %c495_i32_74 dim 1 : vector<8x512xf32>, i32 -> vector<8x512xf32>
    %c64_75 = arith.constant 64 : index
    %c0_76 = arith.constant 0 : index
    %91 = vector.load %arg5[%c64_75, %c0_76] : memref<72x512xf32, #tpu.memory_space<vmem>>, vector<8x512xf32>
    %92 = arith.mulf %90, %91 : vector<8x512xf32>
    %93 = arith.truncf %92 : vector<8x512xf32> to vector<8x512xbf16>
    %c64_77 = arith.constant 64 : index
    %c0_78 = arith.constant 0 : index
    %94 = vector.load %arg7[%c64_77, %c0_78] : memref<72x512xbf16, #tpu.memory_space<vmem>>, vector<8x512xbf16>
    tpu.vector_store %arg7[%c64_77, %c0_78], %93 {strides = array<i32>} : memref<72x512xbf16, #tpu.memory_space<vmem>>, vector<8x512xbf16>,
    %c0_79 = arith.constant 0 : index
    %c0_80 = arith.constant 0 : index
    %95 = vector.load %arg7[%c0_79, %c0_80] : memref<72x512xbf16, #tpu.memory_space<vmem>>, vector<72x512xbf16>
    %cst_81 = arith.constant dense<0.000000e+00> : vector<8x512xf32>
    %96 = tpu.matmul %3, %95, %cst_81 {dimension_numbers = #tpu.dot_dimension_numbers<[1], [0], [0], [1], [0, 0, 1, 1], [], []>} : vector<8x72xbf16>, vector<72x512xbf16>, vector<8x512xf32> -> vector<8x512xf32>
    %97 = vector.broadcast %4 : vector<8x1xf32> to vector<8x512xf32>
    %98 = arith.addf %96, %97 : vector<8x512xf32>
    %99 = arith.addf %98, %1 : vector<8x512xf32>
    %cst_82 = arith.constant 0.000000e+00 : f32
    %100 = vector.broadcast %cst_82 : f32 to vector<8x512xf32>
    %101 = arith.maximumf %99, %100 : vector<8x512xf32>
    %c0_83 = arith.constant 0 : index
    %c0_84 = arith.constant 0 : index
    %c0_85 = arith.constant 0 : index
    %102 = vector.load %arg6[%c0_83, %c0_84, %c0_85] : memref<1x8x512xf32, #tpu.memory_space<vmem>>, vector<1x8x512xf32>
    %103 = vector.shape_cast %102 : vector<1x8x512xf32> to vector<8x512xf32>
    %104 = vector.shape_cast %101 : vector<8x512xf32> to vector<1x8x512xf32>
    tpu.vector_store %arg6[%c0_83, %c0_84, %c0_85], %104 {strides = array<i32>} : memref<1x8x512xf32, #tpu.memory_space<vmem>>, vector<1x8x512xf32>,
    return
  }
  func.func @transform_0(%arg0: i32) -> (i32, i32, i32) {
    %c0_i32 = arith.constant 0 : i32
    %c0_i32_0 = arith.constant 0 : i32
    %c0_i32_1 = arith.constant 0 : i32
    return %arg0, %c0_i32, %c0_i32_0 : i32, i32, i32
  }
  func.func @transform_1(%arg0: i32) -> (i32, i32) {
    %c0_i32 = arith.constant 0 : i32
    %c0_i32_0 = arith.constant 0 : i32
    %c0_i32_1 = arith.constant 0 : i32
    return %c0_i32, %c0_i32_0 : i32, i32
  }
  func.func @transform_2(%arg0: i32) -> (i32, i32) {
    %c0_i32 = arith.constant 0 : i32
    %c0_i32_0 = arith.constant 0 : i32
    %c0_i32_1 = arith.constant 0 : i32
    return %c0_i32, %c0_i32_0 : i32, i32
  }
  func.func @transform_3(%arg0: i32) -> (i32, i32) {
    %c0_i32 = arith.constant 0 : i32
    %c0_i32_0 = arith.constant 0 : i32
    %c0_i32_1 = arith.constant 0 : i32
    return %c0_i32, %c0_i32_0 : i32, i32
  }
  func.func @transform_4(%arg0: i32) -> (i32, i32) {
    %c0_i32 = arith.constant 0 : i32
    %c0_i32_0 = arith.constant 0 : i32
    %c0_i32_1 = arith.constant 0 : i32
    return %c0_i32, %c0_i32_0 : i32, i32
  }
  func.func @transform_5(%arg0: i32) -> (i32, i32, i32) {
    %c0_i32 = arith.constant 0 : i32
    %c0_i32_0 = arith.constant 0 : i32
    %c0_i32_1 = arith.constant 0 : i32
    return %arg0, %c0_i32, %c0_i32_0 : i32, i32, i32
  }
}

</mosaic_0001>

<bundles_post_ra>
// kernel: tpu_custom_call.1
= control target key start
LH: loop header
LB: loop body
LE: loop exit
PB: predicated region body
PF: predicated region fallthrough
CT: control target
= control target key end

     0   :  { %10 = vsyncpa [#allocation4], 0  ;;  %s1950_s0 = inlined_call_operand.hbm [shape: f32[1,8,512], index: 0, kind: input, shape index: {}]   ;;  %s1951_s1 = inlined_call_operand.vmem [shape: bf16[8,72], index: 1, kind: input, shape index: {}]   ;;  %s1952_s2 = inlined_call_operand.vmem [shape: bf16[8,72], index: 2, kind: input, shape index: {}]   ;;  %s1953_s3 = inlined_call_operand.vmem [shape: f32[8,1], index: 3, kind: input, shape index: {}]   ;;  %s1954_s4 = inlined_call_operand.hbm [shape: f32[72,512], index: 4, kind: input, shape index: {}]   ;;  %s1955_s5 = inlined_call_operand.hbm [shape: f32[1,8,512], index: 5, kind: output, shape index: {}]  }
   0x1   :  { %11 = vsyncpa [#allocation7], 0 }
   0x2   :  { %12 = vsyncpa [#allocation5], 0  ;;  %s1405_s18 = smov [#allocation3]   ;;  %s1406_s20 = smov [#allocation6]  }
   0x3   :  { %s19_s19 = sshll.u32 %s1405_s18, 4  ;;  %s34_s21 = sshll.u32 %s1406_s20, 4  ;;  %s20_s19 = int_to_ptr.vmem [resolvable:$true] %s19_s19  ;;  %s1449_s21 = int_to_ptr.vmem [resolvable:$true] %s34_s21 }
   0x4   :  { %s1333_s24 = scalar_lea.hbm %s1950_s0, 512 }
   0x5   :  { %p1334_p0 = scmp.ne.s32.totalorder %s1950_s0, %s1333_s24  ;;  %p1337_p1 = scmp.lt.u32.totalorder %s1333_s24, %s1950_s0 }
   0x7   :  { %p1339_p2 = pnand %p1337_p1, %p1334_p0 }
   0x9   :  { %1342 = shalt.err (!%p1339_p2)
}
   0xa   :  { %s1343_s29 = scalar_lea.vmem %s20_s19, 512  ;;  %p1348_p4 = scmp.lt.s32.totalorder %s20_s19, %s20_s19 }
   0xb   :  { %p1344_p3 = scmp.ne.s32.totalorder %s20_s19, %s1343_s29  ;;  %p1349_p5 = scmp.lt.s32.totalorder %s1343_s29, %s1343_s29 }
   0xd   :  { %p1350_p6 = por %p1349_p5, %p1348_p4 }
   0xf   :  { %p1351_p7 = pnand %p1350_p6, %p1344_p3 }
  0x11   :  { %1354 = shalt.err (!%p1351_p7)
}
  0x12   :  { %22 = dma.hbm_to_vmem [thread:$0]  %s1950_s0, 512, %s20_s19, [#allocation4]  }
  0x13   :  { %s1355_s9 = scalar_lea.hbm %s1954_s4, 4608 }
  0x14   :  { %p1356_p8 = scmp.ne.s32.totalorder %s1954_s4, %s1355_s9  ;;  %p1359_p9 = scmp.lt.u32.totalorder %s1355_s9, %s1954_s4 }
  0x16   :  { %p1361_p10 = pnand %p1359_p9, %p1356_p8 }
  0x18   :  { %1364 = shalt.err (!%p1361_p10)
}
  0x19   :  { %s1365_s14 = scalar_lea.vmem %s1449_s21, 4608  ;;  %p1370_p12 = scmp.lt.s32.totalorder %s1449_s21, %s1449_s21 }
  0x1a   :  { %p1366_p11 = scmp.ne.s32.totalorder %s1449_s21, %s1365_s14  ;;  %p1371_p13 = scmp.lt.s32.totalorder %s1365_s14, %s1365_s14 }
  0x1c   :  { %p1372_p0 = por %p1371_p13, %p1370_p12 }
  0x1e   :  { %p1373_p1 = pnand %p1372_p0, %p1366_p11 }
  0x20   :  { %1376 = shalt.err (!%p1373_p1)
}
  0x21   :  { %s1407_s0 = smov 512   ;;  %s1408_s15 = smov 32  }
  0x22   :  { %40 = dma.hbm_to_vmem [thread:$0]  %s1954_s4, 4608, %s1449_s21, [#allocation7], %s1407_s0, %s1407_s0, %s1408_s15  }
  0x23   :  { %1399 = dma.done.wait [#allocation4], 512  }
  0x24   :  { %1400 = vsyncadd [#allocation4], 4294966784 }
  0x25   :  { %1401 = dma.done.wait [#allocation7], 4608  }
  0x26   :  { %1402 = vsyncadd [#allocation7], 4294962688  ;;  %v1480_v0 = vld [vmem:[#allocation3 + $0x10] sm:$0xff]  ;;  %v1482_v1 = vld [vmem:[#allocation3] sm:$0xff]  ;;  %s1409_s18 = smov 17   ;;  %s1410_s4 = smov 16   ;;  %v63_v6 = vlaneseq }
  0x27   :  { %59 = vrot.lane.b32.xlu1 %v1480_v0, %s1409_s18  ;;  %55 = vrot.lane.b32.xlu0 %v1482_v1, %s1409_s18  ;;  %v1488_v2 = vld [vmem:[#allocation3 + $0x18] sm:$0xff]  ;;  %v1490_v3 = vld [vmem:[#allocation3 + $0x8] sm:$0xff]  ;;  %s1411_s19 = smov 15   ;;  %s1412_s20 = smov 1   ;;  %v1416_v4 = vmov 0   ;;  %v54_v5 = vld [vmem:[%s1953_s3] sm:$0xff] }
  0x28   :  { %s1413_s21 = smov 127   ;;  %s1414_s22 = smov 113   ;;  %549 = vmatprep.mubr.bf16.mxu0 %v1416_v4  ;;  %590 = vmatprep.mubr.bf16.mxu1 %v1416_v4  ;;  %v1558_v9 = vand.u32 127, %v63_v6  ;;  %v1564_v13 = vld [vmem:[#allocation6 + $0x8] sm:$0xff]  ;;  %v1568_v17 = vld [vmem:[#allocation6] sm:$0xff]  ;;  %v1574_v20 = vld [vmem:[#allocation6 + $0x10] sm:$0xff] }
  0x29   :  { %s1415_s23 = smov 112   ;;  %1332 = vset.pattern.permute.xlu0 %v1416_v4  ;;  %s1417_s24 = smov 111   ;;  %v1566_v14 = vld [vmem:[#allocation6 + $0x28] sm:$0xff]  ;;  %v1578_v22 = vld [vmem:[#allocation6 + $0x20] sm:$0xff]  ;;  %v1584_v26 = vld [vmem:[#allocation6 + $0x30] sm:$0xff]  ;;  %vm504_vm8 = vcmask 1043456  }
  0x2a   :  { %vm65_vm0 = vcmp.lt.s32.totalorder %v1558_v9, 17  ;;  %vm104_vm1 = vcmp.lt.s32.totalorder %v1558_v9, 16  ;;  %v1586_v27 = vld [vmem:[#allocation6 + $0x18] sm:$0xff]  ;;  %vm143_vm2 = vcmp.lt.s32.totalorder %v1558_v9, 15  ;;  %vm182_vm3 = vcmp.lt.s32.totalorder %v1558_v9, 1  ;;  %v1604_v48 = vld [vmem:[#allocation6 + $0x48] sm:$0xff] }
  0x2b   :  { %61 = vrot.lane.b32.xlu1 %v1488_v2, %s1409_s18  ;;  %57 = vrot.lane.b32.xlu0 %v1490_v3, %s1409_s18  ;;  %v1588_v28 = vld [vmem:[#allocation6 + $0x38] sm:$0xff]  ;;  %v1608_v50 = vld [vmem:[#allocation6 + $0x68] sm:$0xff]  ;;  %v1610_v53 = vld [vmem:[#allocation6 + $0x40] sm:$0xff]  ;;  %vm239_vm4 = vcmp.lt.s32.totalorder %v1558_v9, 127  ;;  %vm317_vm5 = vcmp.lt.s32.totalorder %v1558_v9, 112  ;;  %vm278_vm6 = vcmp.lt.s32.totalorder %v1558_v9, 113 }
  0x2c   :  { %v1617_v57 = vld [vmem:[#allocation6 + $0x50] sm:$0xff]  ;;  %v1619_v58 = vld [vmem:[#allocation6 + $0x58] sm:$0xff]  ;;  %v1626_v62 = vld [vmem:[#allocation6 + $0x60] sm:$0xff]  ;;  %vm356_vm7 = vcmp.lt.s32.totalorder %v1558_v9, 111  ;;  %vm500_vm9 = vcmask 588800  }
  0x2d   :  { %v1628_v63 = vld [vmem:[#allocation6 + $0x70] sm:$0xff] }
  0x2f   :  { %98 = vrot.lane.b32.xlu1 %v1490_v3, %s1410_s4  ;;  %96 = vrot.lane.b32.xlu0 %v1482_v1, %s1410_s4 }
  0x33   :  { %102 = vrot.lane.b32.xlu1 %v1488_v2, %s1410_s4  ;;  %100 = vrot.lane.b32.xlu0 %v1480_v0, %s1410_s4 }
  0x37   :  { %137 = vrot.lane.b32.xlu1 %v1490_v3, %s1411_s19  ;;  %135 = vrot.lane.b32.xlu0 %v1482_v1, %s1411_s19 }
  0x3b   :  { %141 = vrot.lane.b32.xlu1 %v1488_v2, %s1411_s19  ;;  %139 = vrot.lane.b32.xlu0 %v1480_v0, %s1411_s19 }
  0x3f   :  { %176 = vrot.lane.b32.xlu1 %v1490_v3, %s1412_s20  ;;  %174 = vrot.lane.b32.xlu0 %v1482_v1, %s1412_s20 }
  0x43   :  { %180 = vrot.lane.b32.xlu1 %v1488_v2, %s1412_s20  ;;  %178 = vrot.lane.b32.xlu0 %v1480_v0, %s1412_s20 }
  0x47   :  { %233 = vrot.lane.b32.xlu1 %v1490_v3, %s1413_s21  ;;  %231 = vrot.lane.b32.xlu0 %v1482_v1, %s1413_s21 }
  0x4b   :  { %237 = vrot.lane.b32.xlu1 %v1488_v2, %s1413_s21  ;;  %235 = vrot.lane.b32.xlu0 %v1480_v0, %s1413_s21 }
  0x4f   :  { %272 = vrot.lane.b32.xlu1 %v1490_v3, %s1414_s22  ;;  %270 = vrot.lane.b32.xlu0 %v1482_v1, %s1414_s22 }
  0x53   :  { %276 = vrot.lane.b32.xlu1 %v1488_v2, %s1414_s22  ;;  %274 = vrot.lane.b32.xlu0 %v1480_v0, %s1414_s22 }
  0x57   :  { %311 = vrot.lane.b32.xlu1 %v1490_v3, %s1415_s23  ;;  %309 = vrot.lane.b32.xlu0 %v1482_v1, %s1415_s23 }
  0x5b   :  { %315 = vrot.lane.b32.xlu1 %v1488_v2, %s1415_s23  ;;  %313 = vrot.lane.b32.xlu0 %v1480_v0, %s1415_s23 }
  0x5f   :  { %350 = vrot.lane.b32.xlu1 %v1490_v3, %s1417_s24  ;;  %348 = vrot.lane.b32.xlu0 %v1482_v1, %s1417_s24 }
  0x63   :  { %354 = vrot.lane.b32.xlu1 %v1488_v2, %s1417_s24  ;;  %352 = vrot.lane.b32.xlu0 %v1480_v0, %s1417_s24 }
  0x67   :  { %407 = vperm.xlu0 %1332, %v54_v5   ;;  %v1630_v5 = vld [vmem:[#allocation6 + $0x78] sm:$0xff] }
  0x99   :  { %v60_v7 = vpop.permute.xlu1 %59  ;;  %v56_v8 = vpop.permute.xlu0 %55 }
  0x9d   :  { %v62_v10 = vpop.permute.xlu1 %61  ;;  %v58_v11 = vpop.permute.xlu0 %57 }
  0x9e   :  { %v68_v12 = vsel %vm65_vm0, %v56_v8, %v58_v11  ;;  %v69_v18 = vsel %vm65_vm0, %v62_v10, %v56_v8  ;;  %v67_v21 = vsel %vm65_vm0, %v58_v11, %v60_v7  ;;  %v66_v25 = vsel %vm65_vm0, %v60_v7, %v62_v10 }
  0x9f   :  { %v75_v23 = vmul.f32 %v1564_v13, %v68_v12  ;;  %v74_v29 = vmul.f32 %v1568_v17, %v69_v18  ;;  %v76_v33 = vmul.f32 %v1574_v20, %v67_v21  ;;  %v77_v39 = vmul.f32 %v1586_v27, %v66_v25 }
  0xa1   :  { %v99_v15 = vpop.permute.xlu1 %98  ;;  %v97_v16 = vpop.permute.xlu0 %96 }
  0xa2   :  { %v107_v19 = vsel %vm104_vm1, %v97_v16, %v99_v15 }
  0xa3   :  { %v114_v24 = vmul.f32 %v1566_v14, %v107_v19 }
  0xa5   :  { %v103_v30 = vpop.permute.xlu1 %102  ;;  %v101_v31 = vpop.permute.xlu0 %100  ;;  %v1279_v32 = vpack.c.bf16 %v114_v24, %v75_v23 }
  0xa6   :  { %v108_v34 = vsel %vm104_vm1, %v103_v30, %v97_v16  ;;  %v105_v35 = vsel %vm104_vm1, %v101_v31, %v103_v30  ;;  %v106_v36 = vsel %vm104_vm1, %v99_v15, %v101_v31 }
  0xa7   :  { %v113_v37 = vmul.f32 %v1578_v22, %v108_v34  ;;  %v115_v38 = vmul.f32 %v1584_v26, %v106_v36  ;;  %517 = vmatprep.subr.bf16.mxu0 %v1279_v32  ;;  %v116_v40 = vmul.f32 %v1588_v28, %v105_v35  ;;  %v1645_v32 = vld [vmem:[#allocation6 + $0xa0] sm:$0xff]  ;;  %v1649_v34 = vld [vmem:[#allocation6 + $0xb8] sm:$0xff]  ;;  %v1651_v35 = vld [vmem:[#allocation6 + $0xa8] sm:$0xff] }
  0xa8   :  { %v1653_v36 = vld [vmem:[#allocation6 + $0xb0] sm:$0xff] }
  0xa9   :  { %v138_v41 = vpop.permute.xlu1 %137  ;;  %v136_v42 = vpop.permute.xlu0 %135  ;;  %v1278_v43 = vpack.c.bf16 %v113_v37, %v74_v29  ;;  %v1281_v44 = vpack.c.bf16 %v116_v40, %v77_v39  ;;  %v1280_v45 = vpack.c.bf16 %v115_v38, %v76_v33 }
  0xaa   :  { %v146_v49 = vsel %vm143_vm2, %v136_v42, %v138_v41 }
  0xab   :  { %518 = vmatpush1.bf16.msra.mxu0 %v1278_v43  ;;  %558 = vmatprep.subr.bf16.mxu1 %v1281_v44  ;;  %v153_v56 = vmul.f32 %v1604_v48, %v146_v49 }
  0xac   :  { %559 = vmatpush1.bf16.msra.mxu1 %v1280_v45 }
  0xad   :  { %v142_v46 = vpop.permute.xlu1 %141  ;;  %v140_v47 = vpop.permute.xlu0 %139 }
  0xae   :  { %v147_v54 = vsel %vm143_vm2, %v142_v46, %v136_v42  ;;  %v145_v59 = vsel %vm143_vm2, %v138_v41, %v140_v47  ;;  %v144_v61 = vsel %vm143_vm2, %v140_v47, %v142_v46 }
  0xaf   :  { %v152_v6 = vmul.f32 %v1610_v53, %v147_v54  ;;  %v154_v11 = vmul.f32 %v1617_v57, %v145_v59  ;;  %v155_v18 = vmul.f32 %v1619_v58, %v144_v61  ;;  %v1671_v61 = vld [vmem:[#allocation6 + $0xd8] sm:$0xff] }
  0xb1   :  { %v177_v51 = vpop.permute.xlu1 %176  ;;  %v175_v52 = vpop.permute.xlu0 %174 }
  0xb2   :  { %v185_v55 = vsel %vm182_vm3, %v175_v52, %v177_v51 }
  0xb3   :  { %v192_v60 = vmul.f32 %v1608_v50, %v185_v55 }
  0xb5   :  { %v181_v7 = vpop.permute.xlu1 %180  ;;  %v179_v8 = vpop.permute.xlu0 %178  ;;  %v1283_v10 = vpack.c.bf16 %v192_v60, %v153_v56 }
  0xb6   :  { %v186_v12 = vsel %vm182_vm3, %v181_v7, %v175_v52  ;;  %v183_v15 = vsel %vm182_vm3, %v179_v8, %v181_v7  ;;  %v184_v16 = vsel %vm182_vm3, %v177_v51, %v179_v8  ;;  %v1675_v7 = vld [vmem:[#allocation6 + $0xc8] sm:$0xff] }
  0xb7   :  { %v191_v19 = vmul.f32 %v1626_v62, %v186_v12  ;;  %v193_v21 = vmul.f32 %v1628_v63, %v184_v16  ;;  %v194_v23 = vmul.f32 %v1630_v5, %v183_v15  ;;  %519 = vmatprep.subr.bf16.mxu0 %v1283_v10  ;;  %v1679_v10 = vld [vmem:[#allocation6 + $0xd0] sm:$0xff]  ;;  %v1687_v16 = vld [vmem:[#allocation6 + $0xf8] sm:$0xff] }
  0xb9   :  { %v234_v24 = vpop.permute.xlu1 %233  ;;  %v232_v25 = vpop.permute.xlu0 %231  ;;  %v1282_v29 = vpack.c.bf16 %v191_v19, %v152_v6  ;;  %v1285_v30 = vpack.c.bf16 %v194_v23, %v155_v18  ;;  %v1284_v31 = vpack.c.bf16 %v193_v21, %v154_v11  ;;  %v1681_v11 = vld [vmem:[#allocation6 + $0xe0] sm:$0xff]  ;;  %v1689_v18 = vld [vmem:[#allocation6 + $0xe8] sm:$0xff]  ;;  %v1691_v19 = vld [vmem:[#allocation6 + $0xf0] sm:$0xff] }
  0xba   :  { %v242_v33 = vsel %vm239_vm4, %v232_v25, %v234_v24  ;;  %v1693_v21 = vld [vmem:[#allocation6 + $0xc0] sm:$0xff] }
  0xbb   :  { %520 = vmatpush1.bf16.msra.mxu0 %v1282_v29  ;;  %560 = vmatprep.subr.bf16.mxu1 %v1285_v30  ;;  %v248_v39 = vmul.f32 %v1645_v32, %v242_v33 }
  0xbc   :  { %561 = vmatpush1.bf16.msra.mxu1 %v1284_v31 }
  0xbd   :  { %v238_v37 = vpop.permute.xlu1 %237  ;;  %v236_v38 = vpop.permute.xlu0 %235  ;;  %v1286_v54 = vpack.c.bf16 %v248_v39, %v1482_v1 }
  0xbe   :  { %v243_v40 = vsel %vm239_vm4, %v238_v37, %v232_v25  ;;  %v240_v41 = vsel %vm239_vm4, %v236_v38, %v238_v37  ;;  %v241_v42 = vsel %vm239_vm4, %v234_v24, %v236_v38 }
  0xbf   :  { %v251_v43 = vmul.f32 %v1649_v34, %v243_v40  ;;  %v249_v44 = vmul.f32 %v1651_v35, %v241_v42  ;;  %v250_v45 = vmul.f32 %v1653_v36, %v240_v41 }
  0xc1   :  { %v273_v46 = vpop.permute.xlu1 %272  ;;  %v271_v47 = vpop.permute.xlu0 %270  ;;  %v1287_v49 = vpack.c.bf16 %v249_v44, %v1490_v3  ;;  %v1289_v51 = vpack.c.bf16 %v251_v43, %v1488_v2  ;;  %v1288_v52 = vpack.c.bf16 %v250_v45, %v1480_v0  ;;  %v1712_v44 = vld [vmem:[#allocation6 + $0x100] sm:$0xff] }
  0xc2   :  { %v281_v23 = vsel %vm278_vm6, %v271_v47, %v273_v46 }
  0xc3   :  { %521 = vmatprep.subr.bf16.mxu0 %v1287_v49  ;;  %562 = vmatprep.subr.bf16.mxu1 %v1289_v51  ;;  %v287_v43 = vmul.f32 %v1693_v21, %v281_v23 }
  0xc4   :  { %522 = vmatpush1.bf16.msra.mxu0 %v1286_v54  ;;  %563 = vmatpush1.bf16.msra.mxu1 %v1288_v52 }
  0xc5   :  { %v277_v55 = vpop.permute.xlu1 %276  ;;  %v275_v56 = vpop.permute.xlu0 %274 }
  0xc6   :  { %v282_v6 = vsel %vm278_vm6, %v277_v55, %v271_v47  ;;  %v280_v8 = vsel %vm278_vm6, %v273_v46, %v275_v56  ;;  %v279_v15 = vsel %vm278_vm6, %v275_v56, %v277_v55  ;;  %v1717_v56 = vld [vmem:[#allocation6 + $0x118] sm:$0xff] }
  0xc7   :  { %v290_v24 = vmul.f32 %v1671_v61, %v282_v6  ;;  %v288_v25 = vmul.f32 %v1675_v7, %v280_v8  ;;  %v289_v39 = vmul.f32 %v1679_v10, %v279_v15 }
  0xc9   :  { %v312_v59 = vpop.permute.xlu1 %311  ;;  %v310_v60 = vpop.permute.xlu0 %309 }
  0xca   :  { %v320_v12 = vsel %vm317_vm5, %v310_v60, %v312_v59 }
  0xcb   :  { %v326_v31 = vmul.f32 %v1681_v11, %v320_v12 }
  0xcd   :  { %v316_v29 = vpop.permute.xlu1 %315  ;;  %v314_v30 = vpop.permute.xlu0 %313  ;;  %v1290_v54 = vpack.c.bf16 %v326_v31, %v287_v43 }
  0xce   :  { %v321_v33 = vsel %vm317_vm5, %v316_v29, %v310_v60  ;;  %v318_v37 = vsel %vm317_vm5, %v314_v30, %v316_v29  ;;  %v319_v38 = vsel %vm317_vm5, %v312_v59, %v314_v30  ;;  %v1719_v59 = vld [vmem:[#allocation6 + $0x108] sm:$0xff]  ;;  %v1721_v60 = vld [vmem:[#allocation6 + $0x110] sm:$0xff] }
  0xcf   :  { %v329_v40 = vmul.f32 %v1687_v16, %v321_v33  ;;  %v327_v41 = vmul.f32 %v1689_v18, %v319_v38  ;;  %v328_v42 = vmul.f32 %v1691_v19, %v318_v37 }
  0xd1   :  { %v351_v45 = vpop.permute.xlu1 %350  ;;  %v349_v46 = vpop.permute.xlu0 %348  ;;  %v1291_v47 = vpack.c.bf16 %v327_v41, %v288_v25  ;;  %v1293_v49 = vpack.c.bf16 %v329_v40, %v290_v24  ;;  %v1292_v51 = vpack.c.bf16 %v328_v42, %v289_v39  ;;  %v52_v40 = vld [vmem:[%s1951_s1] sm:$0xf] }
  0xd2   :  { %v359_v52 = vsel %vm356_vm7, %v349_v46, %v351_v45 }
  0xd3   :  { %v365_v55 = vmul.f32 %v1712_v44, %v359_v52  ;;  %523 = vmatprep.subr.bf16.mxu0 %v1291_v47  ;;  %564 = vmatprep.subr.bf16.mxu1 %v1293_v49 }
  0xd4   :  { %524 = vmatpush1.bf16.msra.mxu0 %v1290_v54  ;;  %565 = vmatpush1.bf16.msra.mxu1 %v1292_v51 }
  0xd5   :  { %v355_v6 = vpop.permute.xlu1 %354  ;;  %v353_v8 = vpop.permute.xlu0 %352  ;;  %v1294_v24 = vpack.c.bf16 %v365_v55, %v365_v55 }
  0xd6   :  { %v360_v12 = vsel %vm356_vm7, %v355_v6, %v349_v46  ;;  %v357_v15 = vsel %vm356_vm7, %v353_v8, %v355_v6  ;;  %v358_v23 = vsel %vm356_vm7, %v351_v45, %v353_v8 }
  0xd7   :  { %v368_v25 = vmul.f32 %v1717_v56, %v360_v12  ;;  %v366_v29 = vmul.f32 %v1719_v59, %v358_v23  ;;  %v367_v30 = vmul.f32 %v1721_v60, %v357_v15  ;;  %v506_v38 = vsel %vm504_vm8, %v1294_v24, 0 }
  0xd9   :  { %v1297_v31 = vpack.c.bf16 %v368_v25, %v368_v25  ;;  %v1295_v33 = vpack.c.bf16 %v366_v29, %v366_v29  ;;  %v1296_v37 = vpack.c.bf16 %v367_v30, %v367_v30 }
  0xdb   :  { %1196 = vmatprep.subr.msk.bf16.mxu0 %vm504_vm8, %v1295_v33  ;;  %1198 = vmatprep.subr.msk.bf16.mxu1 %vm504_vm8, %v1297_v31  ;;  %v512_v39 = vsel %vm504_vm8, %v1296_v37, 0 }
  0xdc   :  { %526 = vmatpush1.bf16.msra.mxu0 %v506_v38  ;;  %567 = vmatpush1.bf16.msra.mxu1 %v512_v39 }
  0xdf   :  { %1197 = vmatmul.mubr.msk.bf16.vlgmr.msra.gmra.mrb[0].mxu0 %vm500_vm9, %v52_v40  ;;  %1199 = vmatmul.mubr.msk.bf16.vlgmr.msra.gmra.mrb[0].mxu1 %vm500_vm9, %v52_v40 }
  0xe0   :  { %1080 = vmatprep.mubr.bf16.mxu0 %v1416_v4  ;;  %1121 = vmatprep.mubr.bf16.mxu1 %v1416_v4 }
  0xe6   :  { %v1743_v41 = vpop.permute.xlu0 %407 }
 0x1b2   :  { %v551_v42 = vpop.f32.mrb[0].mxu0  ;;  %v592_v43 = vpop.f32.mrb[0].mxu1 }
 0x1b3   :  { %v552_v45 = vadd.f32 %v551_v42, %v1743_v41  ;;  %v593_v46 = vadd.f32 %v592_v43, %v1743_v41  ;;  %v553_v47 = vpop.f32.mrb[1].mxu0  ;;  %v594_v49 = vpop.f32.mrb[1].mxu1 }
 0x1b4   :  { %v555_v51 = vpop.f32.mrb[2].mxu0  ;;  %v596_v52 = vpop.f32.mrb[2].mxu1  ;;  %v554_v6 = vadd.f32 %v553_v47, %v1743_v41  ;;  %v595_v15 = vadd.f32 %v594_v49, %v1743_v41 }
 0x1b5   :  { %v1747_v54 = vmax.f32 %v552_v45, 0.0  ;;  %v1749_v55 = vmax.f32 %v593_v46, 0.0  ;;  %v556_v8 = vpop.f32.mrb[3].mxu0  ;;  %v597_v4 = vpop.f32.mrb[3].mxu1 }
 0x1b6   :  { %v1756_v12 = vmax.f32 %v554_v6, 0.0  ;;  %v1763_v23 = vmax.f32 %v595_v15, 0.0 }
 0x1b7   :  { %607 = vrot.lane.b32.xlu0 %v1749_v55, %s1409_s18  ;;  %603 = vrot.lane.b32.xlu1 %v1747_v54, %s1409_s18 }
 0x1bb   :  { %641 = vrot.lane.b32.xlu0 %v1747_v54, %s1410_s4  ;;  %605 = vrot.lane.b32.xlu1 %v1756_v12, %s1409_s18 }
 0x1bf   :  { %645 = vrot.lane.b32.xlu0 %v1749_v55, %s1410_s4  ;;  %609 = vrot.lane.b32.xlu1 %v1763_v23, %s1409_s18 }
 0x1c3   :  { %679 = vrot.lane.b32.xlu0 %v1747_v54, %s1411_s19  ;;  %643 = vrot.lane.b32.xlu1 %v1756_v12, %s1410_s4 }
 0x1c7   :  { %683 = vrot.lane.b32.xlu0 %v1749_v55, %s1411_s19  ;;  %647 = vrot.lane.b32.xlu1 %v1763_v23, %s1410_s4 }
 0x1cb   :  { %717 = vrot.lane.b32.xlu0 %v1747_v54, %s1412_s20  ;;  %681 = vrot.lane.b32.xlu1 %v1756_v12, %s1411_s19 }
 0x1cf   :  { %721 = vrot.lane.b32.xlu0 %v1749_v55, %s1412_s20  ;;  %685 = vrot.lane.b32.xlu1 %v1763_v23, %s1411_s19 }
 0x1d3   :  { %773 = vrot.lane.b32.xlu0 %v1747_v54, %s1413_s21  ;;  %719 = vrot.lane.b32.xlu1 %v1756_v12, %s1412_s20 }
 0x1d7   :  { %777 = vrot.lane.b32.xlu0 %v1749_v55, %s1413_s21  ;;  %723 = vrot.lane.b32.xlu1 %v1763_v23, %s1412_s20 }
 0x1db   :  { %811 = vrot.lane.b32.xlu0 %v1747_v54, %s1414_s22  ;;  %775 = vrot.lane.b32.xlu1 %v1756_v12, %s1413_s21 }
 0x1df   :  { %815 = vrot.lane.b32.xlu0 %v1749_v55, %s1414_s22  ;;  %779 = vrot.lane.b32.xlu1 %v1763_v23, %s1413_s21 }
 0x1e3   :  { %849 = vrot.lane.b32.xlu0 %v1747_v54, %s1415_s23  ;;  %813 = vrot.lane.b32.xlu1 %v1756_v12, %s1414_s22 }
 0x1e7   :  { %853 = vrot.lane.b32.xlu0 %v1749_v55, %s1415_s23  ;;  %817 = vrot.lane.b32.xlu1 %v1763_v23, %s1414_s22 }
 0x1eb   :  { %887 = vrot.lane.b32.xlu0 %v1747_v54, %s1417_s24  ;;  %851 = vrot.lane.b32.xlu1 %v1756_v12, %s1415_s23 }
 0x1ef   :  { %891 = vrot.lane.b32.xlu0 %v1749_v55, %s1417_s24  ;;  %855 = vrot.lane.b32.xlu1 %v1763_v23, %s1415_s23 }
 0x1f3   :  { %889 = vrot.lane.b32.xlu1 %v1756_v12, %s1417_s24 }
 0x1f7   :  { %893 = vrot.lane.b32.xlu1 %v1763_v23, %s1417_s24 }
 0x229   :  { %v608_v24 = vpop.permute.xlu0 %607  ;;  %v604_v25 = vpop.permute.xlu1 %603 }
 0x22d   :  { %v642_v29 = vpop.permute.xlu0 %641  ;;  %v606_v30 = vpop.permute.xlu1 %605 }
 0x22e   :  { %v613_v37 = vsel %vm65_vm0, %v604_v25, %v606_v30  ;;  %v612_v49 = vsel %vm65_vm0, %v606_v30, %v608_v24 }
 0x22f   :  { %v620_v42 = vmul.f32 %v613_v37, %v1564_v13 }
 0x231   :  { %v646_v31 = vpop.permute.xlu0 %645  ;;  %v610_v33 = vpop.permute.xlu1 %609 }
 0x232   :  { %v611_v46 = vsel %vm65_vm0, %v608_v24, %v610_v33  ;;  %v614_v47 = vsel %vm65_vm0, %v610_v33, %v604_v25  ;;  %v621_v24 = vmul.f32 %v612_v49, %v1574_v20 }
 0x233   :  { %v619_v4 = vmul.f32 %v614_v47, %v1568_v17  ;;  %v622_v15 = vmul.f32 %v611_v46, %v1586_v27 }
 0x235   :  { %v680_v38 = vpop.permute.xlu0 %679  ;;  %v644_v39 = vpop.permute.xlu1 %643 }
 0x236   :  { %v651_v40 = vsel %vm104_vm1, %v642_v29, %v644_v39  ;;  %v650_v43 = vsel %vm104_vm1, %v644_v39, %v646_v31 }
 0x237   :  { %v658_v45 = vmul.f32 %v651_v40, %v1566_v14  ;;  %v659_v8 = vmul.f32 %v650_v43, %v1584_v26 }
 0x239   :  { %v684_v51 = vpop.permute.xlu0 %683  ;;  %v648_v52 = vpop.permute.xlu1 %647  ;;  %v1299_v6 = vpack.c.bf16 %v658_v45, %v620_v42  ;;  %v1300_v40 = vpack.c.bf16 %v659_v8, %v621_v24 }
 0x23a   :  { %v649_v13 = vsel %vm104_vm1, %v646_v31, %v648_v52  ;;  %v652_v14 = vsel %vm104_vm1, %v648_v52, %v642_v29 }
 0x23b   :  { %v657_v25 = vmul.f32 %v652_v14, %v1578_v22  ;;  %v660_v33 = vmul.f32 %v649_v13, %v1588_v28  ;;  %1048 = vmatprep.subr.bf16.mxu0 %v1299_v6 }
 0x23d   :  { %v1298_v30 = vpack.c.bf16 %v657_v25, %v619_v4  ;;  %v718_v37 = vpop.permute.xlu0 %717  ;;  %v682_v26 = vpop.permute.xlu1 %681  ;;  %v1301_v39 = vpack.c.bf16 %v660_v33, %v622_v15 }
 0x23e   :  { %v689_v17 = vsel %vm143_vm2, %v680_v38, %v682_v26  ;;  %v688_v47 = vsel %vm143_vm2, %v682_v26, %v684_v51 }
 0x23f   :  { %1049 = vmatpush1.bf16.msra.mxu0 %v1298_v30  ;;  %1089 = vmatprep.subr.bf16.mxu1 %v1301_v39  ;;  %v696_v20 = vmul.f32 %v689_v17, %v1604_v48 }
 0x240   :  { %1090 = vmatpush1.bf16.msra.mxu1 %v1300_v40 }
 0x241   :  { %v722_v29 = vpop.permute.xlu0 %721  ;;  %v686_v31 = vpop.permute.xlu1 %685 }
 0x242   :  { %v687_v45 = vsel %vm143_vm2, %v684_v51, %v686_v31  ;;  %v690_v46 = vsel %vm143_vm2, %v686_v31, %v680_v38  ;;  %v697_v51 = vmul.f32 %v688_v47, %v1617_v57 }
 0x243   :  { %v695_v13 = vmul.f32 %v690_v46, %v1610_v53  ;;  %v698_v14 = vmul.f32 %v687_v45, %v1619_v58 }
 0x245   :  { %v774_v27 = vpop.permute.xlu0 %773  ;;  %v720_v22 = vpop.permute.xlu1 %719 }
 0x246   :  { %v727_v28 = vsel %vm182_vm3, %v718_v37, %v720_v22  ;;  %v726_v42 = vsel %vm182_vm3, %v720_v22, %v722_v29 }
 0x247   :  { %v734_v43 = vmul.f32 %v727_v28, %v1608_v50  ;;  %v735_v8 = vmul.f32 %v726_v42, %v1628_v63 }
 0x249   :  { %v778_v49 = vpop.permute.xlu0 %777  ;;  %v724_v52 = vpop.permute.xlu1 %723  ;;  %v1303_v6 = vpack.c.bf16 %v734_v43, %v696_v20  ;;  %v1304_v24 = vpack.c.bf16 %v735_v8, %v697_v51 }
 0x24a   :  { %v725_v48 = vsel %vm182_vm3, %v722_v29, %v724_v52  ;;  %v728_v50 = vsel %vm182_vm3, %v724_v52, %v718_v37 }
 0x24b   :  { %v733_v38 = vmul.f32 %v728_v50, %v1626_v62  ;;  %v736_v4 = vmul.f32 %v725_v48, %v1630_v5  ;;  %1050 = vmatprep.subr.bf16.mxu0 %v1303_v6 }
 0x24d   :  { %v1302_v15 = vpack.c.bf16 %v733_v38, %v695_v13  ;;  %v812_v25 = vpop.permute.xlu0 %811  ;;  %v776_v63 = vpop.permute.xlu1 %775  ;;  %v1305_v33 = vpack.c.bf16 %v736_v4, %v698_v14 }
 0x24e   :  { %v782_v30 = vsel %vm239_vm4, %v776_v63, %v778_v49  ;;  %v783_v53 = vsel %vm239_vm4, %v774_v27, %v776_v63 }
 0x24f   :  { %v789_v58 = vmul.f32 %v783_v53, %v1645_v32  ;;  %v790_v62 = vmul.f32 %v782_v30, %v1651_v35  ;;  %1051 = vmatpush1.bf16.msra.mxu0 %v1302_v15  ;;  %1091 = vmatprep.subr.bf16.mxu1 %v1305_v33 }
 0x250   :  { %1092 = vmatpush1.bf16.msra.mxu1 %v1304_v24 }
 0x251   :  { %v1306_v57 = vpack.c.bf16 %v789_v58, %v1747_v54  ;;  %v816_v5 = vpop.permute.xlu0 %815  ;;  %v780_v37 = vpop.permute.xlu1 %779  ;;  %v1307_v26 = vpack.c.bf16 %v790_v62, %v1756_v12 }
 0x252   :  { %v781_v39 = vsel %vm239_vm4, %v778_v49, %v780_v37  ;;  %v784_v40 = vsel %vm239_vm4, %v780_v37, %v774_v27 }
 0x253   :  { %v791_v29 = vmul.f32 %v781_v39, %v1653_v36  ;;  %v792_v32 = vmul.f32 %v784_v40, %v1649_v34  ;;  %1052 = vmatprep.subr.bf16.mxu0 %v1307_v26 }
 0x254   :  { %1053 = vmatpush1.bf16.msra.mxu0 %v1306_v57 }
 0x255   :  { %v1308_v35 = vpack.c.bf16 %v791_v29, %v1749_v55  ;;  %v850_v31 = vpop.permute.xlu0 %849  ;;  %v814_v54 = vpop.permute.xlu1 %813  ;;  %v1309_v17 = vpack.c.bf16 %v792_v32, %v1763_v23 }
 0x256   :  { %v820_v28 = vsel %vm278_vm6, %v814_v54, %v816_v5  ;;  %v821_v36 = vsel %vm278_vm6, %v812_v25, %v814_v54 }
 0x257   :  { %1093 = vmatprep.subr.bf16.mxu1 %v1309_v17  ;;  %v827_v20 = vmul.f32 %v821_v36, %v1693_v21  ;;  %v828_v23 = vmul.f32 %v820_v28, %v1675_v7 }
 0x258   :  { %1094 = vmatpush1.bf16.msra.mxu1 %v1308_v35 }
 0x259   :  { %v854_v12 = vpop.permute.xlu0 %853  ;;  %v818_v22 = vpop.permute.xlu1 %817 }
 0x25a   :  { %v819_v46 = vsel %vm278_vm6, %v816_v5, %v818_v22  ;;  %v822_v47 = vsel %vm278_vm6, %v818_v22, %v812_v25 }
 0x25b   :  { %v829_v21 = vmul.f32 %v819_v46, %v1679_v10 }
 0x25d   :  { %v852_v27 = vpop.permute.xlu1 %851  ;;  %v888_v42 = vpop.permute.xlu0 %887 }
 0x25e   :  { %v858_v34 = vsel %vm317_vm5, %v852_v27, %v854_v12  ;;  %v859_v55 = vsel %vm317_vm5, %v850_v31, %v852_v27 }
 0x25f   :  { %v865_v43 = vmul.f32 %v859_v55, %v1681_v11  ;;  %v866_v45 = vmul.f32 %v858_v34, %v1689_v18  ;;  %v830_v11 = vmul.f32 %v822_v47, %v1671_v61 }
 0x261   :  { %v1310_v49 = vpack.c.bf16 %v865_v43, %v827_v20  ;;  %v856_v52 = vpop.permute.xlu1 %855  ;;  %v1311_v6 = vpack.c.bf16 %v866_v45, %v828_v23  ;;  %v892_v50 = vpop.permute.xlu0 %891 }
 0x262   :  { %v857_v8 = vsel %vm317_vm5, %v854_v12, %v856_v52  ;;  %v860_v7 = vsel %vm317_vm5, %v856_v52, %v850_v31 }
 0x263   :  { %v867_v18 = vmul.f32 %v857_v8, %v1691_v19  ;;  %v868_v48 = vmul.f32 %v860_v7, %v1687_v16  ;;  %1054 = vmatprep.subr.bf16.mxu0 %v1311_v6 }
 0x264   :  { %1055 = vmatpush1.bf16.msra.mxu0 %v1310_v49 }
 0x265   :  { %v1312_v13 = vpack.c.bf16 %v867_v18, %v829_v21  ;;  %v890_v14 = vpop.permute.xlu1 %889  ;;  %v1313_v38 = vpack.c.bf16 %v868_v48, %v830_v11 }
 0x266   :  { %v896_v4 = vsel %vm356_vm7, %v890_v14, %v892_v50  ;;  %v897_v51 = vsel %vm356_vm7, %v888_v42, %v890_v14 }
 0x267   :  { %v903_v10 = vmul.f32 %v897_v51, %v1712_v44  ;;  %v904_v61 = vmul.f32 %v896_v4, %v1719_v59  ;;  %1095 = vmatprep.subr.bf16.mxu1 %v1313_v38  ;;  %v53_v59 = vld [vmem:[%s1952_s2] sm:$0xf]  ;;  %s1418_s2 = smov [#allocation8]  }
 0x268   :  { %1096 = vmatpush1.bf16.msra.mxu1 %v1312_v13  ;;  %s1148_s29 = sshll.u32 %s1418_s2, 4  ;;  %s1149_s29 = int_to_ptr.vmem [resolvable:$true] %s1148_s29 }
 0x269   :  { %v1314_v19 = vpack.c.bf16 %v903_v10, %v903_v10  ;;  %v1315_v16 = vpack.c.bf16 %v904_v61, %v904_v61  ;;  %v894_v15 = vpop.permute.xlu1 %893  ;;  %s1377_s30 = scalar_lea.vmem %s1149_s29, 512  ;;  %p1382_p3 = scmp.lt.s32.totalorder %s1149_s29, %s1149_s29 }
 0x26a   :  { %v895_v25 = vsel %vm356_vm7, %v892_v50, %v894_v15  ;;  %v898_v63 = vsel %vm356_vm7, %v894_v15, %v888_v42  ;;  %p1378_p2 = scmp.ne.s32.totalorder %s1149_s29, %s1377_s30  ;;  %p1383_p4 = scmp.lt.s32.totalorder %s1377_s30, %s1377_s30 }
 0x26b   :  { %v905_v33 = vmul.f32 %v895_v25, %v1721_v60  ;;  %v906_v24 = vmul.f32 %v898_v63, %v1717_v56  ;;  %1238 = vmatprep.subr.msk.bf16.mxu0 %vm504_vm8, %v1315_v16  ;;  %v1037_v44 = vsel %vm504_vm8, %v1314_v19, 0 }
 0x26c   :  { %1057 = vmatpush1.bf16.msra.mxu0 %v1037_v44  ;;  %p1384_p5 = por %p1383_p4, %p1382_p3 }
 0x26d   :  { %v1316_v30 = vpack.c.bf16 %v905_v33, %v905_v33  ;;  %v1317_v53 = vpack.c.bf16 %v906_v24, %v906_v24 }
 0x26e   :  { %p1385_p6 = pnand %p1384_p5, %p1378_p2 }
 0x26f   :  { %1239 = vmatmul.mubr.msk.bf16.vlgmr.msra.gmra.mrb[4].mxu0 %vm500_vm9, %v53_v59  ;;  %1240 = vmatprep.subr.msk.bf16.mxu1 %vm504_vm8, %v1317_v53  ;;  %v1043_v9 = vsel %vm504_vm8, %v1316_v30, 0 }
 0x270   :  { %1098 = vmatpush1.bf16.msra.mxu1 %v1043_v9 }
 0x273   :  { %1241 = vmatmul.mubr.msk.bf16.vlgmr.msra.gmra.mrb[4].mxu1 %vm500_vm9, %v53_v59 }
 0x342   :  { %v1082_v56 = vpop.f32.mrb[4].mxu0 }
 0x343   :  { %v1083_v60 = vadd.f32 %v1082_v56, %v1743_v41  ;;  %v1084_v58 = vpop.f32.mrb[5].mxu0 }
 0x344   :  { %v1085_v62 = vadd.f32 %v1084_v58, %v1743_v41  ;;  %v1086_v57 = vpop.f32.mrb[6].mxu0 }
 0x345   :  { %v1130_v5 = vadd.f32 %v1083_v60, %v1482_v1  ;;  %v1087_v37 = vpop.f32.mrb[7].mxu0 }
 0x346   :  { %v1131_v26 = vadd.f32 %v1085_v62, %v1490_v3  ;;  %v1123_v39 = vpop.f32.mrb[4].mxu1 }
 0x347   :  { %v1134_v40 = vmax.f32 %v1130_v5, 0.0  ;;  %v1124_v29 = vadd.f32 %v1123_v39, %v1743_v41  ;;  %v1125_v32 = vpop.f32.mrb[5].mxu1 }
 0x348   :  { %v1135_v35 = vmax.f32 %v1131_v26, 0.0  ;;  %v1126_v31 = vadd.f32 %v1125_v32, %v1743_v41  ;;  %v1127_v54 = vpop.f32.mrb[6].mxu1 }
 0x349   :  { %1138 = vst [vmem:[#allocation8] sm:$0xff] %v1134_v40  ;;  %v1132_v17 = vadd.f32 %v1124_v29, %v1480_v0  ;;  %v1128_v12 = vpop.f32.mrb[7].mxu1 }
 0x34a   :  { %1139 = vst [vmem:[#allocation8 + $0x8] sm:$0xff] %v1135_v35  ;;  %v1133_v1 = vadd.f32 %v1126_v31, %v1488_v2 }
 0x34b   :  { %v1136_v22 = vmax.f32 %v1132_v17, 0.0 }
 0x34c   :  { %v1137_v3 = vmax.f32 %v1133_v1, 0.0 }
 0x34d   :  { %1140 = vst [vmem:[#allocation8 + $0x10] sm:$0xff] %v1136_v22 }
 0x34e   :  { %1141 = vst [vmem:[#allocation8 + $0x18] sm:$0xff] %v1137_v3 }
 0x34f   :  { %1388 = shalt.err (!%p1385_p6)
}
 0x350   :  { %s1389_s8 = scalar_lea.hbm %s1955_s5, 512 }
 0x351   :  { %p1390_p7 = scmp.ne.s32.totalorder %s1955_s5, %s1389_s8  ;;  %p1393_p8 = scmp.lt.u32.totalorder %s1389_s8, %s1955_s5 }
 0x353   :  { %p1395_p9 = pnand %p1393_p8, %p1390_p7 }
 0x355   :  { %1398 = shalt.err (!%p1395_p9)
}
 0x356   :  { %1151 = dma.vmem_to_hbm [thread:$0]  %s1149_s29, 512, %s1955_s5, [#allocation5]  }
 0x357   :  { %1403 = dma.done.wait [#allocation5], 512  }
 0x358   :  { %1404 = vsyncadd [#allocation5], 4294966784 }
 0x359   :  { %1155 = vsyncpa [#allocation4], 1 }
 0x35a   :  { %1156 = vsyncpa [#allocation7], 1 }
 0x35b   :  { %1157 = vsyncpa [#allocation5], 1 }

</bundles_post_ra>
